<compile_context>
chip_gen: v5e
topology: v5e:2x2
jax: 0.10.0
libtpu: 0.0.40
codegen_flags: <defaults>
</compile_context>

<pallas_src>
import numpy as np
import jax
import jax.numpy as jnp
from jax.experimental import pallas as pl
from jax.experimental.pallas import tpu as pltpu

H = 5
W = 5
CIN = 2
CMID = 10
IN_FEAT = CIN * H * W            # 50
FEATURES = CMID * H * W          # 250
HIDDEN = 32                      # logical hidden (module default is 200)

# lane-aligned (zero-padded) sizes used inside the kernel
IN_PAD = 64                      # 50  -> 64
FEAT_PAD = 256                   # 250 -> 256
HID_PAD = 128                    # 32  -> 128
OUT_PAD = 128                    # 1   -> 128 (lane-dense output stores)


def conv_to_dense(weight):
    """Expand a 3x3 stride-1 pad-1 conv on a 5x5 grid into a dense
    (Cin*25, Cout*25) matrix so that  out_flat = in_flat @ Wfull  reproduces
    the conv with (c, y, x) row-major flattening on both sides."""
    weight = np.asarray(weight, dtype=np.float32)
    Cout, Cin, KH, KW = weight.shape
    Wfull = np.zeros((Cin * H * W, Cout * H * W), dtype=np.float32)
    for co in range(Cout):
        for ci in range(Cin):
            for ky in range(KH):
                for kx in range(KW):
                    wv = weight[co, ci, ky, kx]
                    for oy in range(H):
                        for ox in range(W):
                            iy, ix = oy + ky - 1, ox + kx - 1
                            if 0 <= iy < H and 0 <= ix < W:
                                Wfull[ci * H * W + iy * W + ix,
                                      co * H * W + oy * W + ox] = wv
    return Wfull


def ppo_reward_kernel(x_ref, idv_ref,
                      w1_ref, b1_ref, w2_ref, b2_ref,
                      wfc1_ref, wfc1id_ref, bfc1_ref,
                      wfc2_ref, bfc2_ref,
                      wout_ref, bout_ref,
                      out_ref):
    x = x_ref[...]                                            # (TB, 64) bf16
    # conv1 (as dense matmul) + bias + relu
    h1 = jnp.dot(x, w1_ref[...], preferred_element_type=jnp.float32) + b1_ref[...]
    h1 = jnp.maximum(h1, 0.0).astype(jnp.bfloat16)            # (TB, 256)
    # conv2 + bias + relu
    h2 = jnp.dot(h1, w2_ref[...], preferred_element_type=jnp.float32) + b2_ref[...]
    h2 = jnp.maximum(h2, 0.0).astype(jnp.bfloat16)            # (TB, 256)
    # fc1 on concat([features, id/10]) -- the id column is folded in as a
    # rank-1 broadcast term (kept in f32) instead of an in-kernel lane concat.
    y = (jnp.dot(h2, wfc1_ref[...], preferred_element_type=jnp.float32)
         + idv_ref[...] * wfc1id_ref[...] + bfc1_ref[...])
    y = jnp.maximum(y, 0.0).astype(jnp.bfloat16)              # (TB, 128)
    # fc2 + relu
    z = jnp.dot(y, wfc2_ref[...], preferred_element_type=jnp.float32) + bfc2_ref[...]
    z = jnp.maximum(z, 0.0).astype(jnp.bfloat16)              # (TB, 128)
    # output head (only lane 0 is meaningful; padded lanes are exactly zero)
    out_ref[...] = (jnp.dot(z, wout_ref[...], preferred_element_type=jnp.float32)
                    + bout_ref[...])                          # (TB, 128) f32


def _round_up(x, m):
    return ((x + m - 1) // m) * m


def _const_spec(shape):
    nd = len(shape)
    return pl.BlockSpec(shape, lambda i, _nd=nd: (0,) * _nd)


def ppo_rewards_forward(obs, idv, params, *, tile_b=512):
    """obs: (B, 2, 5, 5) float32, idv: (B,) float32."""
    B = obs.shape[0]
    assert B % H == 0, "batch must be a multiple of 5 (module reshapes reward to (-1,1,5))"

    # Batch tile: multiple of 8 sublanes; pad batch so tiles divide evenly.
    TB = _round_up(min(tile_b, _round_up(B, 8)), 8)
    B_pad = _round_up(B, TB)
    n_tiles = B_pad // TB

    x_flat = obs.reshape(B, IN_FEAT).astype(jnp.bfloat16)
    x_pad = jnp.zeros((B_pad, IN_PAD), jnp.bfloat16).at[:B, :IN_FEAT].set(x_flat)
    id_pad = jnp.zeros((B_pad, 1), jnp.float32).at[:B, 0].set(
        idv.astype(jnp.float32) / 10.0)

    weights = (params["w1_full"], params["b1_full"],
               params["w2_full"], params["b2_full"],
               params["fc1_w_main"], params["fc1_w_id"], params["fc1_b"],
               params["fc2_w"], params["fc2_b"],
               params["out_w"], params["out_b"])

    flops = 2 * B_pad * (IN_PAD * FEAT_PAD + FEAT_PAD * FEAT_PAD
                         + FEAT_PAD * HID_PAD + HID_PAD * HID_PAD
                         + HID_PAD * OUT_PAD)
    weight_bytes = sum(int(np.prod(w.shape)) * w.dtype.itemsize for w in weights)
    bytes_accessed = (int(x_pad.size) * 2 + int(id_pad.size) * 4
                      + B_pad * OUT_PAD * 4 + weight_bytes)

    in_specs = ([pl.BlockSpec((TB, IN_PAD), lambda i: (i, 0)),
                 pl.BlockSpec((TB, 1), lambda i: (i, 0))]
                + [_const_spec(w.shape) for w in weights])

    out = pl.pallas_call(
        ppo_reward_kernel,
        out_shape=jax.ShapeDtypeStruct((B_pad, OUT_PAD), jnp.float32),
        grid=(n_tiles,),
        in_specs=in_specs,
        out_specs=pl.BlockSpec((TB, OUT_PAD), lambda i: (i, 0)),
        compiler_params=pltpu.CompilerParams(
            dimension_semantics=("parallel",)),
        cost_estimate=pl.CostEstimate(
            flops=flops, transcendentals=0, bytes_accessed=bytes_accessed),
    )(x_pad, id_pad, *weights)

    # reward.reshape(-1,1,5).repeat(1,2,1).view(-1,2,5)  -- pure layout glue.
    reward = out[:B, :1]
    reward = reward.reshape(B // H, 1, H)
    reward = jnp.tile(reward, (1, 2, 1))
    return reward                                             # (B//5, 2, 5)


def make_params(key, hidden=HIDDEN):
    assert hidden <= HID_PAD
    ks = jax.random.split(key, 10)
    conv1_w = jax.random.normal(ks[0], (CMID, CIN, 3, 3), jnp.float32) * 0.2
    conv1_b = jax.random.normal(ks[1], (CMID,), jnp.float32) * 0.1
    conv2_w = jax.random.normal(ks[2], (CMID, CMID, 3, 3), jnp.float32) * 0.1
    conv2_b = jax.random.normal(ks[3], (CMID,), jnp.float32) * 0.1
    fc1_w = jax.random.normal(ks[4], (FEATURES + 1, hidden), jnp.float32) * 0.05
    fc1_b = jax.random.normal(ks[5], (hidden,), jnp.float32) * 0.05
    fc2_w = jax.random.normal(ks[6], (hidden, hidden), jnp.float32) * 0.1
    fc2_b = jax.random.normal(ks[7], (hidden,), jnp.float32) * 0.05
    out_w = jax.random.normal(ks[8], (hidden, 1), jnp.float32) * 0.1
    out_b = jax.random.normal(ks[9], (1,), jnp.float32) * 0.05
    # TODO(synk): phi = ones(10, 5) exists in the module but is unused in forward().

    w1_dense = conv_to_dense(np.asarray(conv1_w))             # (50, 250)
    w2_dense = conv_to_dense(np.asarray(conv2_w))             # (250, 250)
    b1_dense = np.repeat(np.asarray(conv1_b), H * W)          # (250,) channel-major
    b2_dense = np.repeat(np.asarray(conv2_b), H * W)

    def pad2(a, r, c):
        out = np.zeros((r, c), np.float32)
        out[:a.shape[0], :a.shape[1]] = a
        return out

    fc1_np = np.asarray(fc1_w)

    return {
        # reference / original-layout params
        "conv1_w": conv1_w, "conv1_b": conv1_b,
        "conv2_w": conv2_w, "conv2_b": conv2_b,
        "fc1_w": fc1_w, "fc1_b_vec": fc1_b,
        "fc2_w_full": fc2_w, "fc2_b_vec": fc2_b,
        "out_w_full": out_w, "out_b_vec": out_b,
        # kernel-facing params: lane-padded, bf16 matmul operands, f32 biases
        "w1_full": jnp.asarray(pad2(w1_dense, IN_PAD, FEAT_PAD), jnp.bfloat16),
        "b1_full": jnp.asarray(pad2(b1_dense[None, :], 1, FEAT_PAD), jnp.float32),
        "w2_full": jnp.asarray(pad2(w2_dense, FEAT_PAD, FEAT_PAD), jnp.bfloat16),
        "b2_full": jnp.asarray(pad2(b2_dense[None, :], 1, FEAT_PAD), jnp.float32),
        "fc1_w_main": jnp.asarray(pad2(fc1_np[:FEATURES], FEAT_PAD, HID_PAD),
                                  jnp.bfloat16),
        "fc1_w_id": jnp.asarray(pad2(fc1_np[FEATURES:FEATURES + 1], 1, HID_PAD),
                                jnp.float32),
        "fc1_b": jnp.asarray(pad2(np.asarray(fc1_b)[None, :], 1, HID_PAD),
                             jnp.float32),
        "fc2_w": jnp.asarray(pad2(np.asarray(fc2_w), HID_PAD, HID_PAD),
                             jnp.bfloat16),
        "fc2_b": jnp.asarray(pad2(np.asarray(fc2_b)[None, :], 1, HID_PAD),
                             jnp.float32),
        "out_w": jnp.asarray(pad2(np.asarray(out_w), HID_PAD, OUT_PAD),
                             jnp.bfloat16),
        "out_b": jnp.asarray(pad2(np.asarray(out_b)[None, :], 1, OUT_PAD),
                             jnp.float32),
    }


def reference_forward(obs, idv, p):
    """Pure-JAX f32 reference mirroring the PyTorch forward (NCHW convs)."""
    im = obs.reshape(-1, CIN, H, W)
    h = jax.lax.conv_general_dilated(
        im, p["conv1_w"], (1, 1), "SAME",
        dimension_numbers=("NCHW", "OIHW", "NCHW"))
    h = jax.nn.relu(h + p["conv1_b"][None, :, None, None])
    h = jax.lax.conv_general_dilated(
        h, p["conv2_w"], (1, 1), "SAME",
        dimension_numbers=("NCHW", "OIHW", "NCHW"))
    h = jax.nn.relu(h + p["conv2_b"][None, :, None, None])
    y = h.reshape(-1, FEATURES)
    y = jnp.concatenate([y, idv.reshape(-1, 1) / 10.0], axis=1)
    x = jax.nn.relu(y @ p["fc1_w"] + p["fc1_b_vec"])
    x = jax.nn.relu(x @ p["fc2_w_full"] + p["fc2_b_vec"])
    r = x @ p["out_w_full"] + p["out_b_vec"]
    r = r.reshape(-1, 1, H)
    r = jnp.tile(r, (1, 2, 1))
    return r


if __name__ == "__main__":
    key = jax.random.PRNGKey(0)
    pkey, okey, ikey = jax.random.split(key, 3)
    params = make_params(pkey)

    B = 40  # number of observations; multiple of 5 (module reshape) and of 8
    obs = jax.random.normal(okey, (B, CIN, H, W), jnp.float32)
    idv = jax.random.randint(ikey, (B,), 0, 10).astype(jnp.float32)

    out = jax.block_until_ready(ppo_rewards_forward(obs, idv, params))
    ref = jax.block_until_ready(reference_forward(obs, idv, params))

    assert out.shape == (B // H, 2, H), f"unexpected output shape {out.shape}"
    np.testing.assert_allclose(np.asarray(out), np.asarray(ref),
                               rtol=5e-2, atol=5e-2)
    print("KERNEL_OK")
</pallas_src>

<mosaic_0001>
module attributes {stable_mosaic.version = 11 : i64} {
  func.func @ppo_reward_kernel(%arg0: i32, %arg1: memref<40x64xbf16, #tpu.memory_space<vmem>>, %arg2: memref<40x1xf32, #tpu.memory_space<vmem>>, %arg3: memref<64x256xbf16, #tpu.memory_space<vmem>>, %arg4: memref<1x256xf32, #tpu.memory_space<vmem>>, %arg5: memref<256x256xbf16, #tpu.memory_space<vmem>>, %arg6: memref<1x256xf32, #tpu.memory_space<vmem>>, %arg7: memref<256x128xbf16, #tpu.memory_space<vmem>>, %arg8: memref<1x128xf32, #tpu.memory_space<vmem>>, %arg9: memref<1x128xf32, #tpu.memory_space<vmem>>, %arg10: memref<128x128xbf16, #tpu.memory_space<vmem>>, %arg11: memref<1x128xf32, #tpu.memory_space<vmem>>, %arg12: memref<128x128xbf16, #tpu.memory_space<vmem>>, %arg13: memref<1x128xf32, #tpu.memory_space<vmem>>, %arg14: memref<40x128xf32, #tpu.memory_space<vmem>>) attributes {dimension_semantics = [#tpu.dimension_semantics<parallel>], iteration_bounds = array<i64: 1>, scalar_prefetch = 0 : i64, scratch_operands = 0 : i64, tpu.core_type = #tpu.core_type<tc>, window_params = [{transform_indices = @transform_0, window_bounds = array<i64: 40, 64>}, {transform_indices = @transform_1, window_bounds = array<i64: 40, 1>}, {pipeline_mode = #tpu.pipeline_mode<synchronous>, transform_indices = @transform_2, window_bounds = array<i64: 64, 256>}, {pipeline_mode = #tpu.pipeline_mode<synchronous>, transform_indices = @transform_3, window_bounds = array<i64: 1, 256>}, {pipeline_mode = #tpu.pipeline_mode<synchronous>, transform_indices = @transform_4, window_bounds = array<i64: 256, 256>}, {pipeline_mode = #tpu.pipeline_mode<synchronous>, transform_indices = @transform_5, window_bounds = array<i64: 1, 256>}, {pipeline_mode = #tpu.pipeline_mode<synchronous>, transform_indices = @transform_6, window_bounds = array<i64: 256, 128>}, {pipeline_mode = #tpu.pipeline_mode<synchronous>, transform_indices = @transform_7, window_bounds = array<i64: 1, 128>}, {pipeline_mode = #tpu.pipeline_mode<synchronous>, transform_indices = @transform_8, window_bounds = array<i64: 1, 128>}, {pipeline_mode = #tpu.pipeline_mode<synchronous>, transform_indices = @transform_9, window_bounds = array<i64: 128, 128>}, {pipeline_mode = #tpu.pipeline_mode<synchronous>, transform_indices = @transform_10, window_bounds = array<i64: 1, 128>}, {pipeline_mode = #tpu.pipeline_mode<synchronous>, transform_indices = @transform_11, window_bounds = array<i64: 128, 128>}, {pipeline_mode = #tpu.pipeline_mode<synchronous>, transform_indices = @transform_12, window_bounds = array<i64: 1, 128>}, {transform_indices = @transform_13, window_bounds = array<i64: 40, 128>}]} {
    %c0 = arith.constant 0 : index
    %c0_0 = arith.constant 0 : index
    %0 = vector.load %arg1[%c0, %c0_0] : memref<40x64xbf16, #tpu.memory_space<vmem>>, vector<40x64xbf16>
    %c0_1 = arith.constant 0 : index
    %c0_2 = arith.constant 0 : index
    %1 = vector.load %arg3[%c0_1, %c0_2] : memref<64x256xbf16, #tpu.memory_space<vmem>>, vector<64x256xbf16>
    %cst = arith.constant dense<0.000000e+00> : vector<40x256xf32>
    %2 = tpu.matmul %0, %1, %cst {dimension_numbers = #tpu.dot_dimension_numbers<[1], [0], [0], [1], [0, 0, 1, 1], [], []>} : vector<40x64xbf16>, vector<64x256xbf16>, vector<40x256xf32> -> vector<40x256xf32>
    %c0_3 = arith.constant 0 : index
    %c0_4 = arith.constant 0 : index
    %3 = vector.load %arg4[%c0_3, %c0_4] : memref<1x256xf32, #tpu.memory_space<vmem>>, vector<1x256xf32>
    %4 = vector.broadcast %3 : vector<1x256xf32> to vector<40x256xf32>
    %5 = arith.addf %2, %4 : vector<40x256xf32>
    %cst_5 = arith.constant 0.000000e+00 : f32
    %6 = vector.broadcast %cst_5 : f32 to vector<40x256xf32>
    %7 = arith.maximumf %5, %6 : vector<40x256xf32>
    %8 = arith.truncf %7 : vector<40x256xf32> to vector<40x256xbf16>
    %c0_6 = arith.constant 0 : index
    %c0_7 = arith.constant 0 : index
    %9 = vector.load %arg5[%c0_6, %c0_7] : memref<256x256xbf16, #tpu.memory_space<vmem>>, vector<256x256xbf16>
    %cst_8 = arith.constant dense<0.000000e+00> : vector<40x256xf32>
    %10 = tpu.matmul %8, %9, %cst_8 {dimension_numbers = #tpu.dot_dimension_numbers<[1], [0], [0], [1], [0, 0, 1, 1], [], []>} : vector<40x256xbf16>, vector<256x256xbf16>, vector<40x256xf32> -> vector<40x256xf32>
    %c0_9 = arith.constant 0 : index
    %c0_10 = arith.constant 0 : index
    %11 = vector.load %arg6[%c0_9, %c0_10] : memref<1x256xf32, #tpu.memory_space<vmem>>, vector<1x256xf32>
    %12 = vector.broadcast %11 : vector<1x256xf32> to vector<40x256xf32>
    %13 = arith.addf %10, %12 : vector<40x256xf32>
    %cst_11 = arith.constant 0.000000e+00 : f32
    %14 = vector.broadcast %cst_11 : f32 to vector<40x256xf32>
    %15 = arith.maximumf %13, %14 : vector<40x256xf32>
    %16 = arith.truncf %15 : vector<40x256xf32> to vector<40x256xbf16>
    %c0_12 = arith.constant 0 : index
    %c0_13 = arith.constant 0 : index
    %17 = vector.load %arg7[%c0_12, %c0_13] : memref<256x128xbf16, #tpu.memory_space<vmem>>, vector<256x128xbf16>
    %cst_14 = arith.constant dense<0.000000e+00> : vector<40x128xf32>
    %18 = tpu.matmul %16, %17, %cst_14 {dimension_numbers = #tpu.dot_dimension_numbers<[1], [0], [0], [1], [0, 0, 1, 1], [], []>} : vector<40x256xbf16>, vector<256x128xbf16>, vector<40x128xf32> -> vector<40x128xf32>
    %c0_15 = arith.constant 0 : index
    %c0_16 = arith.constant 0 : index
    %19 = vector.load %arg2[%c0_15, %c0_16] : memref<40x1xf32, #tpu.memory_space<vmem>>, vector<40x1xf32>
    %c0_17 = arith.constant 0 : index
    %c0_18 = arith.constant 0 : index
    %20 = vector.load %arg8[%c0_17, %c0_18] : memref<1x128xf32, #tpu.memory_space<vmem>>, vector<1x128xf32>
    %21 = vector.broadcast %19 : vector<40x1xf32> to vector<40x128xf32>
    %22 = vector.broadcast %20 : vector<1x128xf32> to vector<40x128xf32>
    %23 = arith.mulf %21, %22 : vector<40x128xf32>
    %24 = arith.addf %18, %23 : vector<40x128xf32>
    %c0_19 = arith.constant 0 : index
    %c0_20 = arith.constant 0 : index
    %25 = vector.load %arg9[%c0_19, %c0_20] : memref<1x128xf32, #tpu.memory_space<vmem>>, vector<1x128xf32>
    %26 = vector.broadcast %25 : vector<1x128xf32> to vector<40x128xf32>
    %27 = arith.addf %24, %26 : vector<40x128xf32>
    %cst_21 = arith.constant 0.000000e+00 : f32
    %28 = vector.broadcast %cst_21 : f32 to vector<40x128xf32>
    %29 = arith.maximumf %27, %28 : vector<40x128xf32>
    %30 = arith.truncf %29 : vector<40x128xf32> to vector<40x128xbf16>
    %c0_22 = arith.constant 0 : index
    %c0_23 = arith.constant 0 : index
    %31 = vector.load %arg10[%c0_22, %c0_23] : memref<128x128xbf16, #tpu.memory_space<vmem>>, vector<128x128xbf16>
    %cst_24 = arith.constant dense<0.000000e+00> : vector<40x128xf32>
    %32 = tpu.matmul %30, %31, %cst_24 {dimension_numbers = #tpu.dot_dimension_numbers<[1], [0], [0], [1], [0, 0, 1, 1], [], []>} : vector<40x128xbf16>, vector<128x128xbf16>, vector<40x128xf32> -> vector<40x128xf32>
    %c0_25 = arith.constant 0 : index
    %c0_26 = arith.constant 0 : index
    %33 = vector.load %arg11[%c0_25, %c0_26] : memref<1x128xf32, #tpu.memory_space<vmem>>, vector<1x128xf32>
    %34 = vector.broadcast %33 : vector<1x128xf32> to vector<40x128xf32>
    %35 = arith.addf %32, %34 : vector<40x128xf32>
    %cst_27 = arith.constant 0.000000e+00 : f32
    %36 = vector.broadcast %cst_27 : f32 to vector<40x128xf32>
    %37 = arith.maximumf %35, %36 : vector<40x128xf32>
    %38 = arith.truncf %37 : vector<40x128xf32> to vector<40x128xbf16>
    %c0_28 = arith.constant 0 : index
    %c0_29 = arith.constant 0 : index
    %39 = vector.load %arg12[%c0_28, %c0_29] : memref<128x128xbf16, #tpu.memory_space<vmem>>, vector<128x128xbf16>
    %cst_30 = arith.constant dense<0.000000e+00> : vector<40x128xf32>
    %40 = tpu.matmul %38, %39, %cst_30 {dimension_numbers = #tpu.dot_dimension_numbers<[1], [0], [0], [1], [0, 0, 1, 1], [], []>} : vector<40x128xbf16>, vector<128x128xbf16>, vector<40x128xf32> -> vector<40x128xf32>
    %c0_31 = arith.constant 0 : index
    %c0_32 = arith.constant 0 : index
    %41 = vector.load %arg13[%c0_31, %c0_32] : memref<1x128xf32, #tpu.memory_space<vmem>>, vector<1x128xf32>
    %42 = vector.broadcast %41 : vector<1x128xf32> to vector<40x128xf32>
    %43 = arith.addf %40, %42 : vector<40x128xf32>
    %c0_33 = arith.constant 0 : index
    %c0_34 = arith.constant 0 : index
    %44 = vector.load %arg14[%c0_33, %c0_34] : memref<40x128xf32, #tpu.memory_space<vmem>>, vector<40x128xf32>
    tpu.vector_store %arg14[%c0_33, %c0_34], %43 {strides = array<i32>} : memref<40x128xf32, #tpu.memory_space<vmem>>, vector<40x128xf32>,
    return
  }
  func.func @transform_0(%arg0: i32) -> (i32, i32) {
    %c0_i32 = arith.constant 0 : i32
    %c0_i32_0 = arith.constant 0 : i32
    return %arg0, %c0_i32 : i32, i32
  }
  func.func @transform_1(%arg0: i32) -> (i32, i32) {
    %c0_i32 = arith.constant 0 : i32
    %c0_i32_0 = arith.constant 0 : i32
    return %arg0, %c0_i32 : i32, i32
  }
  func.func @transform_2(%arg0: i32) -> (i32, i32) {
    %c0_i32 = arith.constant 0 : i32
    %c0_i32_0 = arith.constant 0 : i32
    %c0_i32_1 = arith.constant 0 : i32
    return %c0_i32, %c0_i32_0 : i32, i32
  }
  func.func @transform_3(%arg0: i32) -> (i32, i32) {
    %c0_i32 = arith.constant 0 : i32
    %c0_i32_0 = arith.constant 0 : i32
    %c0_i32_1 = arith.constant 0 : i32
    return %c0_i32, %c0_i32_0 : i32, i32
  }
  func.func @transform_4(%arg0: i32) -> (i32, i32) {
    %c0_i32 = arith.constant 0 : i32
    %c0_i32_0 = arith.constant 0 : i32
    %c0_i32_1 = arith.constant 0 : i32
    return %c0_i32, %c0_i32_0 : i32, i32
  }
  func.func @transform_5(%arg0: i32) -> (i32, i32) {
    %c0_i32 = arith.constant 0 : i32
    %c0_i32_0 = arith.constant 0 : i32
    %c0_i32_1 = arith.constant 0 : i32
    return %c0_i32, %c0_i32_0 : i32, i32
  }
  func.func @transform_6(%arg0: i32) -> (i32, i32) {
    %c0_i32 = arith.constant 0 : i32
    %c0_i32_0 = arith.constant 0 : i32
    %c0_i32_1 = arith.constant 0 : i32
    return %c0_i32, %c0_i32_0 : i32, i32
  }
  func.func @transform_7(%arg0: i32) -> (i32, i32) {
    %c0_i32 = arith.constant 0 : i32
    %c0_i32_0 = arith.constant 0 : i32
    %c0_i32_1 = arith.constant 0 : i32
    return %c0_i32, %c0_i32_0 : i32, i32
  }
  func.func @transform_8(%arg0: i32) -> (i32, i32) {
    %c0_i32 = arith.constant 0 : i32
    %c0_i32_0 = arith.constant 0 : i32
    %c0_i32_1 = arith.constant 0 : i32
    return %c0_i32, %c0_i32_0 : i32, i32
  }
  func.func @transform_9(%arg0: i32) -> (i32, i32) {
    %c0_i32 = arith.constant 0 : i32
    %c0_i32_0 = arith.constant 0 : i32
    %c0_i32_1 = arith.constant 0 : i32
    return %c0_i32, %c0_i32_0 : i32, i32
  }
  func.func @transform_10(%arg0: i32) -> (i32, i32) {
    %c0_i32 = arith.constant 0 : i32
    %c0_i32_0 = arith.constant 0 : i32
    %c0_i32_1 = arith.constant 0 : i32
    return %c0_i32, %c0_i32_0 : i32, i32
  }
  func.func @transform_11(%arg0: i32) -> (i32, i32) {
    %c0_i32 = arith.constant 0 : i32
    %c0_i32_0 = arith.constant 0 : i32
    %c0_i32_1 = arith.constant 0 : i32
    return %c0_i32, %c0_i32_0 : i32, i32
  }
  func.func @transform_12(%arg0: i32) -> (i32, i32) {
    %c0_i32 = arith.constant 0 : i32
    %c0_i32_0 = arith.constant 0 : i32
    %c0_i32_1 = arith.constant 0 : i32
    return %c0_i32, %c0_i32_0 : i32, i32
  }
  func.func @transform_13(%arg0: i32) -> (i32, i32) {
    %c0_i32 = arith.constant 0 : i32
    %c0_i32_0 = arith.constant 0 : i32
    return %arg0, %c0_i32 : i32, i32
  }
}

</mosaic_0001>

<bundles_post_ra>
// kernel: tpu_custom_call.1
= control target key start
LH: loop header
LB: loop body
LE: loop exit
PB: predicated region body
PF: predicated region fallthrough
CT: control target
= control target key end

     0   :  { %18 = vsyncpa [#allocation3], 0  ;;  %s1737_s0 = inlined_call_operand.vmem [shape: bf16[40,64], index: 0, kind: input, shape index: {}]   ;;  %s1738_s1 = inlined_call_operand.vmem [shape: f32[40,1], index: 1, kind: input, shape index: {}]   ;;  %s1739_s2 = inlined_call_operand.hbm [shape: bf16[64,256], index: 2, kind: input, shape index: {}]   ;;  %s1740_s3 = inlined_call_operand.vmem [shape: f32[1,256], index: 3, kind: input, shape index: {}]   ;;  %s1741_s4 = inlined_call_operand.hbm [shape: bf16[256,256], index: 4, kind: input, shape index: {}]   ;;  %s1742_s5 = inlined_call_operand.vmem [shape: f32[1,256], index: 5, kind: input, shape index: {}]   ;;  %s1743_s6 = inlined_call_operand.hbm [shape: bf16[256,128], index: 6, kind: input, shape index: {}]   ;;  %s1744_s7 = inlined_call_operand.vmem [shape: f32[1,128], index: 7, kind: input, shape index: {}]   ;;  %s1745_s8 = inlined_call_operand.vmem [shape: f32[1,128], index: 8, kind: input, shape index: {}]   ;;  %s1746_s9 = inlined_call_operand.hbm [shape: bf16[128,128], index: 9, kind: input, shape index: {}]   ;;  %s1747_s10 = inlined_call_operand.vmem [shape: f32[1,128], index: 10, kind: input, shape index: {}]   ;;  %s1748_s11 = inlined_call_operand.hbm [shape: bf16[128,128], index: 11, kind: input, shape index: {}]   ;;  %s1749_s12 = inlined_call_operand.vmem [shape: f32[1,128], index: 12, kind: input, shape index: {}]   ;;  %s1750_s13 = inlined_call_operand.hbm [shape: f32[40,128], index: 13, kind: output, shape index: {}]  }
   0x1   :  { %19 = vsyncpa [#allocation6], 0 }
   0x2   :  { %20 = vsyncpa [#allocation9], 0 }
   0x3   :  { %21 = vsyncpa [#allocation4], 0  ;;  %s45_s27 = sshll.u32 %s1741_s4, 4  ;;  %s1574_s28 = smov [#allocation5]   ;;  %s46_s27 = int_to_ptr.hbm [resolvable:$true] %s45_s27 }
   0x4   :  { %s47_s29 = sshll.u32 %s1574_s28, 4  ;;  %s1575_s30 = smov 128   ;;  %s48_s29 = int_to_ptr.vmem [resolvable:$true] %s47_s29 }
   0x5   :  { %s1576_s14 = smov 8   ;;  %s77_s17 = sshll.u32 %s1746_s9, 4  ;;  %s78_s17 = int_to_ptr.hbm [resolvable:$true] %s77_s17 }
   0x6   :  { %53 = dma.hbm_to_vmem [thread:$0]  %s46_s27, 4096, %s48_s29, [#allocation6], %s1575_s30, %s1575_s30, %s1576_s14  }
   0x7   :  { %s1577_s18 = smov [#allocation8]   ;;  %s30_s4 = sshll.u32 %s1739_s2, 4  ;;  %s31_s4 = int_to_ptr.hbm [resolvable:$true] %s30_s4 }
   0x8   :  { %s79_s19 = sshll.u32 %s1577_s18, 4  ;;  %s1578_s22 = smov 64   ;;  %s80_s19 = int_to_ptr.vmem [resolvable:$true] %s79_s19 }
   0x9   :  { %s1579_s23 = smov 4   ;;  %s60_s26 = sshll.u32 %s1743_s6, 4  ;;  %s61_s26 = int_to_ptr.hbm [resolvable:$true] %s60_s26 }
   0xa   :  { %85 = dma.hbm_to_vmem [thread:$0]  %s78_s17, 1024, %s80_s19, [#allocation9], %s1578_s22, %s1578_s22, %s1579_s23  }
   0xb   :  { %s1580_s27 = smov [#allocation2]   ;;  %s1581_s9 = smov [#allocation7]  }
   0xc   :  { %s32_s28 = sshll.u32 %s1580_s27, 4  ;;  %s62_s29 = sshll.u32 %s1581_s9, 4  ;;  %s33_s28 = int_to_ptr.vmem [resolvable:$true] %s32_s28  ;;  %s63_s29 = int_to_ptr.vmem [resolvable:$true] %s62_s29 }
   0xd   :  { %38 = dma.hbm_to_vmem [thread:$0]  %s31_s4, 1024, %s33_s28, [#allocation3], %s1575_s30, %s1575_s30, %s1576_s14  }
   0xe   :  { %s92_s16 = sshll.u32 %s1748_s11, 4  ;;  %s1582_s17 = smov [#allocation10]   ;;  %s93_s16 = int_to_ptr.hbm [resolvable:$true] %s92_s16 }
   0xf   :  { %68 = dma.hbm_to_vmem [thread:$0]  %s61_s26, 2048, %s63_s29, [#allocation6], %s1578_s22, %s1578_s22, %s1579_s23  }
  0x10   :  { %s94_s18 = sshll.u32 %s1582_s17, 4  ;;  %s95_s18 = int_to_ptr.vmem [resolvable:$true] %s94_s18 }
  0x11   :  { %100 = dma.hbm_to_vmem [thread:$0]  %s93_s16, 1024, %s95_s18, [#allocation9], %s1578_s22, %s1578_s22, %s1579_s23  }
  0x12   :  { %1566 = dma.done.wait [#allocation3], 1024  }
  0x13   :  { %1567 = vsyncadd [#allocation3], 4294966272 }
  0x14   :  { %1568 = dma.done.wait [#allocation6], 6144  }
  0x15   :  { %1569 = vsyncadd [#allocation6], 4294961152 }
  0x16   :  { %1570 = dma.done.wait [#allocation9], 2048  }
  0x17   :  { %1571 = vsyncadd [#allocation9], 4294965248  ;;  %v1054_v0 = vld [vmem:[#allocation2 + $0x30] sm:$0xf]  ;;  %v1331_v1 = vld [vmem:[#allocation2 + $0x34] sm:$0xf0] }
  0x18   :  { %v1330_v2 = vld [vmem:[#allocation2 + $0x34] sm:$0xf]  ;;  %v1055_v3 = vor.u32 %v1331_v1, %v1054_v0  ;;  %v1056_v4 = vld [vmem:[#allocation2 + $0x38] sm:$0xf0]  ;;  %v1046_v5 = vld [vmem:[#allocation2 + $0x20] sm:$0xf] }
  0x19   :  { %v1329_v6 = vld [vmem:[#allocation2 + $0x24] sm:$0xf0]  ;;  %v1059_v7 = vor.u32 %v1330_v2, %v1056_v4  ;;  %v1328_v8 = vld [vmem:[#allocation2 + $0x24] sm:$0xf]  ;;  %v1048_v9 = vld [vmem:[#allocation2 + $0x28] sm:$0xf0] }
  0x1a   :  { %210 = vmatpush.bf16.msra.mxu0 %v1055_v3  ;;  %v1047_v10 = vor.u32 %v1329_v6, %v1046_v5  ;;  %1396 = vmatpush.bf16.msra.mxu2 %v1055_v3  ;;  %v1051_v11 = vor.u32 %v1328_v8, %v1048_v9  ;;  %v1038_v12 = vld [vmem:[#allocation2 + $0x10] sm:$0xf]  ;;  %v1327_v13 = vld [vmem:[#allocation2 + $0x14] sm:$0xf0]  ;;  %v1326_v14 = vld [vmem:[#allocation2 + $0x14] sm:$0xf] }
  0x1b   :  { %233 = vmatpush.bf16.msra.mxu1 %v1059_v7  ;;  %1400 = vmatpush.bf16.msra.mxu3 %v1059_v7  ;;  %v1040_v15 = vld [vmem:[#allocation2 + $0x18] sm:$0xf0]  ;;  %v1039_v16 = vor.u32 %v1327_v13, %v1038_v12  ;;  %v128_v17 = vld [vmem:[%s1737_s0 + $0x10] sm:$0xf]  ;;  %v1030_v19 = vld [vmem:[#allocation2] sm:$0xf] }
  0x1c   :  { %v1043_v18 = vor.u32 %v1326_v14, %v1040_v15  ;;  %v1325_v20 = vld [vmem:[#allocation2 + $0x4] sm:$0xf0]  ;;  %v1324_v21 = vld [vmem:[#allocation2 + $0x4] sm:$0xf]  ;;  %v1032_v22 = vld [vmem:[#allocation2 + $0x8] sm:$0xf0]  ;;  %v152_v24 = vunpack.c.l.b16 %v128_v17 }
  0x1d   :  { %v1124_v23 = vld [vmem:[#allocation5 + $0x70] sm:$0xf]  ;;  %v1347_v25 = vld [vmem:[#allocation5 + $0x74] sm:$0xf0]  ;;  %v1031_v28 = vor.u32 %v1325_v20, %v1030_v19  ;;  %v1035_v29 = vor.u32 %v1324_v21, %v1032_v22  ;;  %v1322_v30 = vld [vmem:[%s1737_s0] sm:$0xff]  ;;  %vm196_vm0 = vcmask 523264  }
  0x1e   :  { %211 = vmatpush.bf16.msra.mxu0 %v1047_v10  ;;  %1397 = vmatpush.bf16.msra.mxu2 %v1047_v10  ;;  %v1188_v26 = vld [vmem:[#allocation5 + $0xf0] sm:$0xf]  ;;  %v1363_v27 = vld [vmem:[#allocation5 + $0xf4] sm:$0xf0]  ;;  %v1346_v31 = vld [vmem:[#allocation5 + $0x74] sm:$0xf]  ;;  %v1125_v33 = vor.u32 %v1347_v25, %v1124_v23  ;;  %v155_v38 = vpack.c.b16 %v152_v24, %v152_v24 }
  0x1f   :  { %234 = vmatpush.bf16.msra.mxu1 %v1051_v11  ;;  %1401 = vmatpush.bf16.msra.mxu3 %v1051_v11  ;;  %v1126_v32 = vld [vmem:[#allocation5 + $0x78] sm:$0xf0]  ;;  %v1189_v34 = vor.u32 %v1363_v27, %v1188_v26  ;;  %v1362_v35 = vld [vmem:[#allocation5 + $0xf4] sm:$0xf]  ;;  %v1116_v37 = vld [vmem:[#allocation5 + $0x60] sm:$0xf] }
  0x20   :  { %v1190_v36 = vld [vmem:[#allocation5 + $0xf8] sm:$0xf0]  ;;  %v1345_v39 = vld [vmem:[#allocation5 + $0x64] sm:$0xf0]  ;;  %v1180_v40 = vld [vmem:[#allocation5 + $0xe0] sm:$0xf]  ;;  %v1129_v45 = vor.u32 %v1346_v31, %v1126_v32 }
  0x21   :  { %v1361_v41 = vld [vmem:[#allocation5 + $0xe4] sm:$0xf0]  ;;  %v1344_v42 = vld [vmem:[#allocation5 + $0x64] sm:$0xf]  ;;  %v1118_v43 = vld [vmem:[#allocation5 + $0x68] sm:$0xf0]  ;;  %v1193_v46 = vor.u32 %v1362_v35, %v1190_v36  ;;  %v1117_v50 = vor.u32 %v1345_v39, %v1116_v37 }
  0x22   :  { %212 = vmatpush.bf16.msra.mxu0 %v1039_v16  ;;  %1398 = vmatpush.bf16.msra.mxu2 %v1039_v16  ;;  %v1360_v44 = vld [vmem:[#allocation5 + $0xe4] sm:$0xf]  ;;  %v1182_v47 = vld [vmem:[#allocation5 + $0xe8] sm:$0xf0]  ;;  %v1108_v48 = vld [vmem:[#allocation5 + $0x50] sm:$0xf]  ;;  %v1181_v51 = vor.u32 %v1361_v41, %v1180_v40  ;;  %v1121_v54 = vor.u32 %v1344_v42, %v1118_v43 }
  0x23   :  { %235 = vmatpush.bf16.msra.mxu1 %v1043_v18  ;;  %1402 = vmatpush.bf16.msra.mxu3 %v1043_v18  ;;  %v1343_v49 = vld [vmem:[#allocation5 + $0x54] sm:$0xf0]  ;;  %v1172_v52 = vld [vmem:[#allocation5 + $0xd0] sm:$0xf]  ;;  %v1185_v55 = vor.u32 %v1360_v44, %v1182_v47  ;;  %v1342_v56 = vld [vmem:[#allocation5 + $0x54] sm:$0xf] }
  0x24   :  { %v1359_v53 = vld [vmem:[#allocation5 + $0xd4] sm:$0xf0]  ;;  %v1110_v57 = vld [vmem:[#allocation5 + $0x58] sm:$0xf0]  ;;  %v1109_v58 = vor.u32 %v1343_v49, %v1108_v48  ;;  %v1358_v60 = vld [vmem:[#allocation5 + $0xd4] sm:$0xf] }
  0x25   :  { %v1173_v59 = vor.u32 %v1359_v53, %v1172_v52  ;;  %v1174_v61 = vld [vmem:[#allocation5 + $0xd8] sm:$0xf0]  ;;  %v1100_v62 = vld [vmem:[#allocation5 + $0x40] sm:$0xf]  ;;  %v1341_v63 = vld [vmem:[#allocation5 + $0x44] sm:$0xf0]  ;;  %v1113_v2 = vor.u32 %v1342_v56, %v1110_v57 }
  0x26   :  { %213 = vmatpush.bf16.msra.mxu0 %v1031_v28  ;;  %1399 = vmatpush.bf16.msra.mxu2 %v1031_v28  ;;  %v1164_v0 = vld [vmem:[#allocation5 + $0xc0] sm:$0xf]  ;;  %v1357_v1 = vld [vmem:[#allocation5 + $0xc4] sm:$0xf0]  ;;  %v1177_v3 = vor.u32 %v1358_v60, %v1174_v61  ;;  %v1340_v4 = vld [vmem:[#allocation5 + $0x44] sm:$0xf]  ;;  %v1101_v5 = vor.u32 %v1341_v63, %v1100_v62 }
  0x27   :  { %236 = vmatpush.bf16.msra.mxu1 %v1035_v29  ;;  %1403 = vmatpush.bf16.msra.mxu3 %v1035_v29  ;;  %v1165_v6 = vor.u32 %v1357_v1, %v1164_v0  ;;  %v1102_v7 = vld [vmem:[#allocation5 + $0x48] sm:$0xf0]  ;;  %v1356_v8 = vld [vmem:[#allocation5 + $0xc4] sm:$0xf]  ;;  %v1092_v13 = vld [vmem:[#allocation5 + $0x30] sm:$0xf] }
  0x28   :  { %v1166_v9 = vld [vmem:[#allocation5 + $0xc8] sm:$0xf0]  ;;  %v1105_v10 = vor.u32 %v1340_v4, %v1102_v7  ;;  %v1339_v14 = vld [vmem:[#allocation5 + $0x34] sm:$0xf0]  ;;  %v1156_v15 = vld [vmem:[#allocation5 + $0xb0] sm:$0xf] }
  0x29   :  { %1060 = vmatmul.msk.bf16.vlgmr.msra.gmra.mxu0 %vm196_vm0, %v1322_v30  ;;  %1062 = vmatmul.msk.bf16.vlgmr.msra.gmra.mxu2 %vm196_vm0, %v155_v38  ;;  %v1169_v11 = vor.u32 %v1356_v8, %v1166_v9  ;;  %v1323_v12 = vld [vmem:[%s1737_s0 + $0x8] sm:$0xff]  ;;  %v1093_v16 = vor.u32 %v1339_v14, %v1092_v13  ;;  %v1355_v17 = vld [vmem:[#allocation5 + $0xb4] sm:$0xf0]  ;;  %v1338_v18 = vld [vmem:[#allocation5 + $0x34] sm:$0xf]  ;;  %s1584_s11 = smov [#allocation11]  }
  0x2a   :  { %466 = vmatpush.bf16.msrb.mxu2 %v1125_v33  ;;  %1063 = vmatmul.msk.bf16.vlgmr.msra.gmra.mxu1 %vm196_vm0, %v1322_v30  ;;  %v1094_v19 = vld [vmem:[#allocation5 + $0x38] sm:$0xf0]  ;;  %v1157_v20 = vor.u32 %v1355_v17, %v1156_v15  ;;  %v1354_v22 = vld [vmem:[#allocation5 + $0xb4] sm:$0xf]  ;;  %v1084_v25 = vld [vmem:[#allocation5 + $0x20] sm:$0xf] }
  0x2b   :  { %489 = vmatpush.bf16.msrb.mxu3 %v1189_v34  ;;  %512 = vmatpush.bf16.msrb.mxu0 %v1129_v45  ;;  %v1097_v21 = vor.u32 %v1338_v18, %v1094_v19  ;;  %v1158_v23 = vld [vmem:[#allocation5 + $0xb8] sm:$0xf0]  ;;  %v1337_v26 = vld [vmem:[#allocation5 + $0x24] sm:$0xf0]  ;;  %v1148_v28 = vld [vmem:[#allocation5 + $0xa0] sm:$0xf] }
  0x2c   :  { %1065 = vmatmul.msk.bf16.vlgmr.msra.gmra.mxu3 %vm196_vm0, %v155_v38  ;;  %535 = vmatpush.bf16.msrb.mxu1 %v1193_v46  ;;  %v1161_v24 = vor.u32 %v1354_v22, %v1158_v23  ;;  %v1085_v27 = vor.u32 %v1337_v26, %v1084_v25  ;;  %v1353_v29 = vld [vmem:[#allocation5 + $0xa4] sm:$0xf0]  ;;  %v1336_v30 = vld [vmem:[#allocation5 + $0x24] sm:$0xf]  ;;  %v1086_v32 = vld [vmem:[#allocation5 + $0x28] sm:$0xf0] }
  0x2d   :  { %v1149_v31 = vor.u32 %v1353_v29, %v1148_v28  ;;  %v1352_v33 = vld [vmem:[#allocation5 + $0xa4] sm:$0xf]  ;;  %v1150_v34 = vld [vmem:[#allocation5 + $0xa8] sm:$0xf0]  ;;  %v1089_v35 = vor.u32 %v1336_v30, %v1086_v32  ;;  %v1076_v37 = vld [vmem:[#allocation5 + $0x10] sm:$0xf] }
  0x2e   :  { %467 = vmatpush.bf16.msrb.mxu2 %v1117_v50  ;;  %v1153_v36 = vor.u32 %v1352_v33, %v1150_v34  ;;  %v1335_v38 = vld [vmem:[#allocation5 + $0x14] sm:$0xf0]  ;;  %v1140_v39 = vld [vmem:[#allocation5 + $0x90] sm:$0xf]  ;;  %v1334_v42 = vld [vmem:[#allocation5 + $0x14] sm:$0xf] }
  0x2f   :  { %490 = vmatpush.bf16.msrb.mxu3 %v1181_v51  ;;  %513 = vmatpush.bf16.msrb.mxu0 %v1121_v54  ;;  %v1077_v40 = vor.u32 %v1335_v38, %v1076_v37  ;;  %v1351_v41 = vld [vmem:[#allocation5 + $0x94] sm:$0xf0]  ;;  %v1078_v43 = vld [vmem:[#allocation5 + $0x18] sm:$0xf0]  ;;  %v1350_v46 = vld [vmem:[#allocation5 + $0x94] sm:$0xf] }
  0x30   :  { %536 = vmatpush.bf16.msrb.mxu1 %v1185_v55  ;;  %v1141_v44 = vor.u32 %v1351_v41, %v1140_v39  ;;  %v1081_v45 = vor.u32 %v1334_v42, %v1078_v43  ;;  %v1142_v47 = vld [vmem:[#allocation5 + $0x98] sm:$0xf0]  ;;  %v1068_v49 = vld [vmem:[#allocation5] sm:$0xf]  ;;  %v1333_v50 = vld [vmem:[#allocation5 + $0x4] sm:$0xf0] }
  0x31   :  { %v1145_v48 = vor.u32 %v1350_v46, %v1142_v47  ;;  %v1132_v51 = vld [vmem:[#allocation5 + $0x80] sm:$0xf]  ;;  %v1069_v52 = vor.u32 %v1333_v50, %v1068_v49  ;;  %v1349_v53 = vld [vmem:[#allocation5 + $0x84] sm:$0xf0]  ;;  %v1332_v54 = vld [vmem:[#allocation5 + $0x4] sm:$0xf] }
  0x32   :  { %468 = vmatpush.bf16.msrb.mxu2 %v1109_v58  ;;  %v1070_v55 = vld [vmem:[#allocation5 + $0x8] sm:$0xf0]  ;;  %v1133_v56 = vor.u32 %v1349_v53, %v1132_v51  ;;  %v1348_v58 = vld [vmem:[#allocation5 + $0x84] sm:$0xf]  ;;  %v137_v61 = vld [vmem:[%s1740_s3] sm:$0x3] }
  0x33   :  { %491 = vmatpush.bf16.msrb.mxu3 %v1173_v59  ;;  %514 = vmatpush.bf16.msrb.mxu0 %v1113_v2  ;;  %v1073_v57 = vor.u32 %v1332_v54, %v1070_v55  ;;  %v1134_v59 = vld [vmem:[#allocation5 + $0x88] sm:$0xf0]  ;;  %v139_v0 = vperm.slane %v137_v61, 0  ;;  %v140_v1 = vperm.slane %v137_v61, 1  ;;  %v1371_v19 = vld [vmem:[#allocation7 + $0x38] sm:$0xff]  ;;  %v1370_v22 = vld [vmem:[#allocation7 + $0x30] sm:$0xff] }
  0x34   :  { %537 = vmatpush.bf16.msrb.mxu1 %v1177_v3  ;;  %v1137_v60 = vor.u32 %v1348_v58, %v1134_v59  ;;  %v1378_v23 = vld [vmem:[#allocation7 + $0x70] sm:$0xff]  ;;  %v1377_v25 = vld [vmem:[#allocation7 + $0x68] sm:$0xff]  ;;  %v1368_v32 = vld [vmem:[#allocation7 + $0x20] sm:$0xff]  ;;  %s1003_s19 = sshll.u32 %s1584_s11, 4  ;;  %s1005_s4 = sshll.u32 %s1750_s13, 4  ;;  %s1004_s19 = int_to_ptr.vmem [resolvable:$true] %s1003_s19  ;;  %s1006_s4 = int_to_ptr.hbm [resolvable:$true] %s1005_s4 }
  0x35   :  { %v1376_v33 = vld [vmem:[#allocation7 + $0x60] sm:$0xff]  ;;  %v1375_v47 = vld [vmem:[#allocation7 + $0x58] sm:$0xff]  ;;  %v1374_v49 = vld [vmem:[#allocation7 + $0x50] sm:$0xff] }
  0x36   :  { %469 = vmatpush.bf16.msrb.mxu2 %v1101_v5  ;;  %v1373_v50 = vld [vmem:[#allocation7 + $0x48] sm:$0xff]  ;;  %v1372_v51 = vld [vmem:[#allocation7 + $0x40] sm:$0xff] }
  0x37   :  { %492 = vmatpush.bf16.msrb.mxu3 %v1165_v6  ;;  %515 = vmatpush.bf16.msrb.mxu0 %v1105_v10  ;;  %v1364_v53 = vld [vmem:[#allocation7] sm:$0xff] }
  0x38   :  { %538 = vmatpush.bf16.msrb.mxu1 %v1169_v11  ;;  %v606_v54 = vld [vmem:[%s1738_s1] sm:$0xff] }
  0x39   :  { %1061 = vmatmul.msk.bf16.gmra.mxu0 %vm196_vm0, %v1323_v12  ;;  %v300_v55 = vld [vmem:[%s1742_s5] sm:$0x3] }
  0x3a   :  { %1064 = vmatmul.msk.bf16.gmra.mxu1 %vm196_vm0, %v1323_v12  ;;  %470 = vmatpush.bf16.msrb.mxu2 %v1093_v16  ;;  %v303_v58 = vperm.slane %v300_v55, 1 }
  0x3b   :  { %493 = vmatpush.bf16.msrb.mxu3 %v1157_v20  ;;  %516 = vmatpush.bf16.msrb.mxu0 %v1097_v21  ;;  %v1379_v20 = vld [vmem:[#allocation7 + $0x78] sm:$0xff] }
  0x3c   :  { %539 = vmatpush.bf16.msrb.mxu1 %v1161_v24  ;;  %v1369_v24 = vld [vmem:[#allocation7 + $0x28] sm:$0xff] }
  0x3e   :  { %471 = vmatpush.bf16.msrb.mxu2 %v1085_v27 }
  0x3f   :  { %494 = vmatpush.bf16.msrb.mxu3 %v1149_v31  ;;  %517 = vmatpush.bf16.msrb.mxu0 %v1089_v35 }
  0x40   :  { %540 = vmatpush.bf16.msrb.mxu1 %v1153_v36 }
  0x42   :  { %472 = vmatpush.bf16.msrb.mxu2 %v1077_v40  ;;  %v1367_v40 = vld [vmem:[#allocation7 + $0x18] sm:$0xff] }
  0x43   :  { %495 = vmatpush.bf16.msrb.mxu3 %v1141_v44  ;;  %518 = vmatpush.bf16.msrb.mxu0 %v1081_v45 }
  0x44   :  { %541 = vmatpush.bf16.msrb.mxu1 %v1145_v48  ;;  %v1366_v48 = vld [vmem:[#allocation7 + $0x10] sm:$0xff] }
  0x46   :  { %473 = vmatpush.bf16.msrb.mxu2 %v1069_v52  ;;  %v1365_v52 = vld [vmem:[#allocation7 + $0x8] sm:$0xff] }
  0x47   :  { %496 = vmatpush.bf16.msrb.mxu3 %v1133_v56  ;;  %519 = vmatpush.bf16.msrb.mxu0 %v1073_v57  ;;  %v1583_v56 = vmov 0  }
  0x48   :  { %542 = vmatpush.bf16.msrb.mxu1 %v1137_v60  ;;  %1415 = vset.pattern.permute.xlu0 %v1583_v56  ;;  %v607_v60 = vld [vmem:[%s1738_s1 + $0x8] sm:$0xff] }
  0x49   :  { %1416 = vset.pattern.permute.xlu1 %v1583_v56  ;;  %614 = vperm.xlu0 %1415, %v606_v54  }
  0x4a   :  { %741 = vmatpush.bf16.msra.mxu2 %v1371_v19  ;;  %1417 = vset.pattern.permute.xlu2 %v1583_v56 }
  0x4b   :  { %764 = vmatpush.bf16.msra.mxu3 %v1379_v20 }
  0x4e   :  { %742 = vmatpush.bf16.msra.mxu2 %v1370_v22 }
  0x4f   :  { %765 = vmatpush.bf16.msra.mxu3 %v1378_v23 }
  0x51   :  { %619 = vperm.xlu0 %1415, %v607_v60  }
  0x52   :  { %743 = vmatpush.bf16.msra.mxu2 %v1369_v24 }
  0x53   :  { %766 = vmatpush.bf16.msra.mxu3 %v1377_v25  ;;  %v610_v25 = vld [vmem:[%s1738_s1 + $0x20] sm:$0xff] }
  0x54   :  { %634 = vperm.xlu2 %1417, %v610_v25  }
  0x56   :  { %744 = vmatpush.bf16.msra.mxu2 %v1368_v32 }
  0x57   :  { %767 = vmatpush.bf16.msra.mxu3 %v1376_v33 }
  0x5a   :  { %745 = vmatpush.bf16.msra.mxu2 %v1367_v40 }
  0x5b   :  { %768 = vmatpush.bf16.msra.mxu3 %v1375_v47 }
  0x5e   :  { %746 = vmatpush.bf16.msra.mxu2 %v1366_v48 }
  0x5f   :  { %769 = vmatpush.bf16.msra.mxu3 %v1374_v49 }
  0x62   :  { %747 = vmatpush.bf16.msra.mxu2 %v1365_v52 }
  0x63   :  { %770 = vmatpush.bf16.msra.mxu3 %v1373_v50 }
  0x66   :  { %748 = vmatpush.bf16.msra.mxu2 %v1364_v53 }
  0x67   :  { %771 = vmatpush.bf16.msra.mxu3 %v1372_v51 }
  0xa6   :  { %v215_v62 = vpop.f32.mrf.mxu0 }
  0xa7   :  { %v238_v63 = vpop.f32.mrf.mxu1  ;;  %v216_v3 = vadd.f32 %v215_v62, %v139_v0 }
  0xa8   :  { %v239_v5 = vadd.f32 %v238_v63, %v140_v1  ;;  %v1703_v63 = vperm.slane %v300_v55, 0 }
  0xa9   :  { %v252_v10 = vmax.f32 %v216_v3, 0.0 }
  0xaa   :  { %v253_v12 = vmax.f32 %v239_v5, 0.0 }
  0xac   :  { %v225_v2 = vpop.f32.mrf.mxu2 }
  0xad   :  { %v226_v41 = vadd.f32 %v225_v2, %v139_v0 }
  0xae   :  { %v217_v6 = vpop.f32.mrf.mxu0 }
  0xaf   :  { %v248_v4 = vpop.f32.mrf.mxu3  ;;  %v218_v7 = vadd.f32 %v217_v6, %v139_v0  ;;  %v240_v8 = vpop.f32.mrf.mxu1  ;;  %v260_v43 = vmax.f32 %v226_v41, 0.0 }
  0xb0   :  { %v241_v9 = vadd.f32 %v240_v8, %v140_v1  ;;  %v249_v42 = vadd.f32 %v248_v4, %v140_v1 }
  0xb1   :  { %v254_v11 = vmax.f32 %v218_v7, 0.0  ;;  %v266_v45 = vpack.c.bf16 %v260_v43, %v260_v43 }
  0xb2   :  { %v255_v13 = vmax.f32 %v241_v9, 0.0  ;;  %v261_v44 = vmax.f32 %v249_v42, 0.0 }
  0xb3   :  { %v262_v14 = vpack.c.bf16 %v254_v11, %v252_v10  ;;  %v609_v10 = vld [vmem:[%s1738_s1 + $0x18] sm:$0xff] }
  0xb4   :  { %v263_v15 = vpack.c.bf16 %v255_v13, %v253_v12  ;;  %v227_v16 = vpop.f32.mrf.mxu2  ;;  %v267_v46 = vpack.c.bf16 %v261_v44, %v261_v44 }
  0xb5   :  { %474 = vmatmul.bf16.vlgmr.msrb.gmra.mxu2 %v262_v14  ;;  %520 = vmatmul.bf16.vlgmr.msrb.gmra.mxu0 %v262_v14 }
  0xb6   :  { %497 = vmatmul.bf16.vlgmr.msrb.gmra.mxu3 %v263_v15  ;;  %543 = vmatmul.bf16.vlgmr.msrb.gmra.mxu1 %v263_v15  ;;  %v220_v18 = vpop.f32.mrf.mxu0 }
  0xb7   :  { %v250_v17 = vpop.f32.mrf.mxu3  ;;  %v243_v21 = vpop.f32.mrf.mxu1  ;;  %v221_v26 = vadd.f32 %v220_v18, %v139_v0 }
  0xb8   :  { %v244_v27 = vadd.f32 %v243_v21, %v140_v1 }
  0xb9   :  { %v256_v34 = vmax.f32 %v221_v26, 0.0  ;;  %v1387_v26 = vld [vmem:[#allocation8 + $0x38] sm:$0xff] }
  0xba   :  { %v257_v36 = vmax.f32 %v244_v27, 0.0  ;;  %872 = vmatpush.bf16.msra.mxu0 %v1387_v26 }
  0xbe   :  { %v222_v28 = vpop.f32.mrf.mxu0 }
  0xbf   :  { %v223_v29 = vadd.f32 %v222_v28, %v139_v0  ;;  %v245_v30 = vpop.f32.mrf.mxu1 }
  0xc0   :  { %v246_v31 = vadd.f32 %v245_v30, %v140_v1  ;;  %v608_v1 = vld [vmem:[%s1738_s1 + $0x10] sm:$0xff] }
  0xc1   :  { %v258_v35 = vmax.f32 %v223_v29, 0.0  ;;  %624 = vperm.xlu1 %1416, %v608_v1   ;;  %v1382_v1 = vld [vmem:[#allocation8 + $0x10] sm:$0xff] }
  0xc2   :  { %v259_v37 = vmax.f32 %v246_v31, 0.0  ;;  %v1386_v31 = vld [vmem:[#allocation8 + $0x30] sm:$0xff] }
  0xc3   :  { %v264_v38 = vpack.c.bf16 %v258_v35, %v256_v34  ;;  %873 = vmatpush.bf16.msra.mxu0 %v1386_v31 }
  0xc4   :  { %v265_v39 = vpack.c.bf16 %v259_v37, %v257_v36  ;;  %v1385_v36 = vld [vmem:[#allocation8 + $0x28] sm:$0xff] }
  0xc5   :  { %479 = vmatmul.bf16.gmra.mxu2 %v264_v38  ;;  %525 = vmatmul.bf16.gmra.mxu0 %v264_v38 }
  0xc6   :  { %502 = vmatmul.bf16.gmra.mxu3 %v265_v39  ;;  %548 = vmatmul.bf16.gmra.mxu1 %v265_v39 }
  0xc7   :  { %874 = vmatpush.bf16.msra.mxu0 %v1385_v36 }
  0xc9   :  { %629 = vperm.xlu1 %1416, %v609_v10  }
  0xd5   :  { %484 = vmatmul.bf16.gmra.mxu2 %v266_v45  ;;  %530 = vmatmul.bf16.gmra.mxu0 %v266_v45 }
  0xd6   :  { %507 = vmatmul.bf16.gmra.mxu3 %v267_v46  ;;  %553 = vmatmul.bf16.gmra.mxu1 %v267_v46  ;;  %v1384_v46 = vld [vmem:[#allocation8 + $0x20] sm:$0xff] }
  0xd7   :  { %875 = vmatpush.bf16.msra.mxu0 %v1384_v46 }
 0x132   :  { %v521_v57 = vpop.f32.mrf.mxu0 }
 0x133   :  { %v544_v59 = vpop.f32.mrf.mxu1  ;;  %v522_v61 = vadd.f32 %v521_v57, %v303_v58 }
 0x135   :  { %v545_v3 = vadd.f32 %v544_v59, %v522_v61 }
 0x137   :  { %v559_v8 = vmax.f32 %v545_v3, 0.0  ;;  %v1380_v3 = vld [vmem:[#allocation8] sm:$0xff] }
 0x138   :  { %v475_v62 = vpop.f32.mrf.mxu2 }
 0x139   :  { %v498_v0 = vpop.f32.mrf.mxu3  ;;  %v476_v6 = vadd.f32 %v475_v62, %v1703_v63 }
 0x13a   :  { %v523_v2 = vpop.f32.mrf.mxu0 }
 0x13b   :  { %v524_v4 = vadd.f32 %v523_v2, %v303_v58  ;;  %v546_v5 = vpop.f32.mrf.mxu1  ;;  %v499_v12 = vadd.f32 %v498_v0, %v476_v6  ;;  %v1383_v0 = vld [vmem:[#allocation8 + $0x18] sm:$0xff]  ;;  %v1381_v2 = vld [vmem:[#allocation8 + $0x8] sm:$0xff] }
 0x13c   :  { %876 = vmatpush.bf16.msra.mxu0 %v1383_v0 }
 0x13d   :  { %v547_v7 = vadd.f32 %v546_v5, %v524_v4  ;;  %v558_v19 = vmax.f32 %v499_v12, 0.0  ;;  %v1418_v5 = vld [vmem:[%s1744_s7] ss:$0 sm:$0xff] }
 0x13f   :  { %v561_v9 = vmax.f32 %v547_v7, 0.0 }
 0x140   :  { %v477_v11 = vpop.f32.mrf.mxu2  ;;  %877 = vmatpush.bf16.msra.mxu0 %v1382_v1 }
 0x141   :  { %v569_v13 = vpack.c.bf16 %v561_v9, %v559_v8  ;;  %v478_v14 = vadd.f32 %v477_v11, %v1703_v63  ;;  %v500_v15 = vpop.f32.mrf.mxu3 }
 0x142   :  { %v526_v16 = vpop.f32.mrf.mxu0 }
 0x143   :  { %v501_v17 = vadd.f32 %v500_v15, %v478_v14  ;;  %v549_v18 = vpop.f32.mrf.mxu1  ;;  %772 = vmatmul.bf16.vlgmr.msra.gmra.mxu3 %v569_v13  ;;  %v527_v22 = vadd.f32 %v526_v16, %v303_v58  ;;  %v1419_v13 = vld [vmem:[%s1745_s8] ss:$0 sm:$0xff]  ;;  %v625_v16 = vpop.permute.xlu1 %624 }
 0x144   :  { %878 = vmatpush.bf16.msra.mxu0 %v1381_v2 }
 0x145   :  { %v560_v20 = vmax.f32 %v501_v17, 0.0  ;;  %v550_v28 = vadd.f32 %v549_v18, %v527_v22  ;;  %v642_v22 = vmul.f32 %v1418_v5, %v625_v16 }
 0x147   :  { %v568_v21 = vpack.c.bf16 %v560_v20, %v558_v19  ;;  %v563_v34 = vmax.f32 %v550_v28, 0.0  ;;  %v1395_v28 = vld [vmem:[#allocation10 + $0x38] sm:$0xff] }
 0x148   :  { %v480_v23 = vpop.f32.mrf.mxu2  ;;  %879 = vmatpush.bf16.msra.mxu0 %v1380_v3  ;;  %971 = vmatpush.bf16.msra.mxu1 %v1395_v28 }
 0x149   :  { %v503_v24 = vpop.f32.mrf.mxu3  ;;  %749 = vmatmul.bf16.vlgmr.msra.gmra.mxu2 %v568_v21  ;;  %v481_v32 = vadd.f32 %v480_v23, %v1703_v63 }
 0x14a   :  { %v528_v27 = vpop.f32.mrf.mxu0 }
 0x14b   :  { %v529_v29 = vadd.f32 %v528_v27, %v303_v58  ;;  %v551_v30 = vpop.f32.mrf.mxu1  ;;  %v504_v38 = vadd.f32 %v503_v24, %v481_v32 }
 0x14d   :  { %v552_v33 = vadd.f32 %v551_v30, %v529_v29  ;;  %v562_v47 = vmax.f32 %v504_v38, 0.0  ;;  %v630_v29 = vpop.permute.xlu1 %629  ;;  %v1394_v30 = vld [vmem:[#allocation10 + $0x30] sm:$0xff] }
 0x14e   :  { %v643_v31 = vmul.f32 %v1418_v5, %v630_v29  ;;  %972 = vmatpush.bf16.msra.mxu1 %v1394_v30 }
 0x14f   :  { %v565_v35 = vmax.f32 %v552_v33, 0.0 }
 0x150   :  { %v482_v37 = vpop.f32.mrf.mxu2 }
 0x151   :  { %v483_v39 = vadd.f32 %v482_v37, %v1703_v63  ;;  %v505_v40 = vpop.f32.mrf.mxu3  ;;  %v571_v41 = vpack.c.bf16 %v565_v35, %v563_v34  ;;  %v1393_v35 = vld [vmem:[#allocation10 + $0x28] sm:$0xff]  ;;  %v635_v37 = vpop.permute.xlu2 %634 }
 0x152   :  { %v531_v42 = vpop.f32.mrf.mxu0  ;;  %973 = vmatpush.bf16.msra.mxu1 %v1393_v35 }
 0x153   :  { %v506_v43 = vadd.f32 %v505_v40, %v483_v39  ;;  %777 = vmatmul.bf16.gmra.mxu3 %v571_v41  ;;  %v532_v44 = vadd.f32 %v531_v42, %v303_v58  ;;  %v554_v45 = vpop.f32.mrf.mxu1  ;;  %v644_v41 = vmul.f32 %v1418_v5, %v635_v37  ;;  %v1392_v42 = vld [vmem:[#allocation10 + $0x20] sm:$0xff] }
 0x155   :  { %v564_v48 = vmax.f32 %v506_v43, 0.0  ;;  %v555_v50 = vadd.f32 %v554_v45, %v532_v44 }
 0x156   :  { %974 = vmatpush.bf16.msra.mxu1 %v1392_v42 }
 0x157   :  { %v570_v49 = vpack.c.bf16 %v564_v48, %v562_v47  ;;  %v567_v55 = vmax.f32 %v555_v50, 0.0  ;;  %v1391_v48 = vld [vmem:[#allocation10 + $0x18] sm:$0xff] }
 0x158   :  { %v485_v51 = vpop.f32.mrf.mxu2 }
 0x159   :  { %754 = vmatmul.bf16.gmra.mxu2 %v570_v49  ;;  %v486_v52 = vadd.f32 %v485_v51, %v1703_v63  ;;  %v508_v53 = vpop.f32.mrf.mxu3  ;;  %v573_v59 = vpack.c.bf16 %v567_v55, %v567_v55  ;;  %v615_v63 = vpop.permute.xlu0 %614  ;;  %v1390_v51 = vld [vmem:[#allocation10 + $0x10] sm:$0xff] }
 0x15a   :  { %v533_v54 = vpop.f32.mrf.mxu0  ;;  %v640_v6 = vmul.f32 %v1418_v5, %v615_v63  ;;  %975 = vmatpush.bf16.msra.mxu1 %v1391_v48 }
 0x15b   :  { %v556_v56 = vpop.f32.mrf.mxu1  ;;  %v509_v57 = vadd.f32 %v508_v53, %v486_v52 }
 0x15c   :  { %v1389_v56 = vld [vmem:[#allocation10 + $0x8] sm:$0xff] }
 0x15d   :  { %v566_v58 = vmax.f32 %v509_v57, 0.0  ;;  %v1388_v57 = vld [vmem:[#allocation10] sm:$0xff] }
 0x15e   :  { %976 = vmatpush.bf16.msra.mxu1 %v1390_v51 }
 0x15f   :  { %v572_v62 = vpack.c.bf16 %v566_v58, %v566_v58 }
 0x160   :  { %v487_v60 = vpop.f32.mrf.mxu2 }
 0x161   :  { %v510_v61 = vpop.f32.mrf.mxu3  ;;  %v620_v10 = vpop.permute.xlu0 %619  ;;  %v1420_v60 = vld [vmem:[%s1747_s10] ss:$0 sm:$0xff] }
 0x162   :  { %v641_v11 = vmul.f32 %v1418_v5, %v620_v10  ;;  %977 = vmatpush.bf16.msra.mxu1 %v1389_v56 }
 0x163   :  { %782 = vmatmul.bf16.gmra.mxu3 %v573_v59 }
 0x166   :  { %978 = vmatpush.bf16.msra.mxu1 %v1388_v57 }
 0x169   :  { %759 = vmatmul.bf16.gmra.mxu2 %v572_v62 }
 0x1c6   :  { %v773_v4 = vpop.f32.mrf.mxu3 }
 0x1cc   :  { %v750_v7 = vpop.f32.mrf.mxu2 }
 0x1cd   :  { %v751_v9 = vadd.f32 %v750_v7, %v640_v6 }
 0x1ce   :  { %v775_v8 = vpop.f32.mrf.mxu3 }
 0x1cf   :  { %v774_v12 = vadd.f32 %v773_v4, %v751_v9 }
 0x1d1   :  { %v791_v18 = vadd.f32 %v1419_v13, %v774_v12 }
 0x1d3   :  { %v796_v21 = vmax.f32 %v791_v18, 0.0 }
 0x1d4   :  { %v752_v14 = vpop.f32.mrf.mxu2 }
 0x1d5   :  { %v753_v15 = vadd.f32 %v752_v14, %v641_v11  ;;  %v1421_v14 = vld [vmem:[%s1749_s12] ss:$0 sm:$0xff] }
 0x1d6   :  { %v778_v17 = vpop.f32.mrf.mxu3 }
 0x1d7   :  { %v776_v19 = vadd.f32 %v775_v8, %v753_v15 }
 0x1d9   :  { %v792_v20 = vadd.f32 %v1419_v13, %v776_v19 }
 0x1db   :  { %v797_v23 = vmax.f32 %v792_v20, 0.0 }
 0x1dc   :  { %v755_v24 = vpop.f32.mrf.mxu2 }
 0x1dd   :  { %v801_v25 = vpack.c.bf16 %v797_v23, %v796_v21  ;;  %v756_v27 = vadd.f32 %v755_v24, %v642_v22 }
 0x1de   :  { %v780_v26 = vpop.f32.mrf.mxu3 }
 0x1df   :  { %880 = vmatmul.bf16.vlgmr.msra.gmra.mxu0 %v801_v25  ;;  %v779_v32 = vadd.f32 %v778_v17, %v756_v27 }
 0x1e1   :  { %v793_v39 = vadd.f32 %v1419_v13, %v779_v32 }
 0x1e3   :  { %v798_v43 = vmax.f32 %v793_v39, 0.0 }
 0x1e4   :  { %v757_v33 = vpop.f32.mrf.mxu2 }
 0x1e5   :  { %v758_v34 = vadd.f32 %v757_v33, %v643_v31 }
 0x1e6   :  { %v783_v36 = vpop.f32.mrf.mxu3 }
 0x1e7   :  { %v781_v38 = vadd.f32 %v780_v26, %v758_v34 }
 0x1e9   :  { %v794_v40 = vadd.f32 %v1419_v13, %v781_v38 }
 0x1eb   :  { %v799_v44 = vmax.f32 %v794_v40, 0.0 }
 0x1ec   :  { %v760_v45 = vpop.f32.mrf.mxu2 }
 0x1ed   :  { %v802_v46 = vpack.c.bf16 %v799_v44, %v798_v43  ;;  %v761_v47 = vadd.f32 %v760_v45, %v644_v41 }
 0x1ee   :  { %v785_v49 = vpop.f32.mrf.mxu3 }
 0x1ef   :  { %885 = vmatmul.bf16.gmra.mxu0 %v802_v46  ;;  %v784_v50 = vadd.f32 %v783_v36, %v761_v47 }
 0x1f1   :  { %v795_v52 = vadd.f32 %v1419_v13, %v784_v50 }
 0x1f3   :  { %v800_v54 = vmax.f32 %v795_v52, 0.0 }
 0x1f4   :  { %v762_v53 = vpop.f32.mrf.mxu2 }
 0x1f5   :  { %v803_v55 = vpack.c.bf16 %v800_v54, %v800_v54 }
 0x1ff   :  { %890 = vmatmul.bf16.gmra.mxu0 %v803_v55 }
 0x25c   :  { %v881_v59 = vpop.f32.mrf.mxu0 }
 0x25d   :  { %v882_v58 = vadd.f32 %v1420_v60, %v881_v59 }
 0x25f   :  { %v895_v0 = vmax.f32 %v882_v58, 0.0 }
 0x264   :  { %v883_v61 = vpop.f32.mrf.mxu0 }
 0x265   :  { %v884_v62 = vadd.f32 %v1420_v60, %v883_v61 }
 0x267   :  { %v896_v1 = vmax.f32 %v884_v62, 0.0 }
 0x269   :  { %v900_v2 = vpack.c.bf16 %v896_v1, %v895_v0 }
 0x26b   :  { %979 = vmatmul.bf16.vlgmr.msra.gmra.mxu1 %v900_v2 }
 0x26c   :  { %v886_v3 = vpop.f32.mrf.mxu0 }
 0x26d   :  { %v887_v63 = vadd.f32 %v1420_v60, %v886_v3 }
 0x26f   :  { %v897_v6 = vmax.f32 %v887_v63, 0.0 }
 0x274   :  { %v888_v4 = vpop.f32.mrf.mxu0 }
 0x275   :  { %v889_v5 = vadd.f32 %v1420_v60, %v888_v4 }
 0x277   :  { %v898_v7 = vmax.f32 %v889_v5, 0.0 }
 0x279   :  { %v901_v8 = vpack.c.bf16 %v898_v7, %v897_v6 }
 0x27b   :  { %984 = vmatmul.bf16.gmra.mxu1 %v901_v8 }
 0x27c   :  { %v891_v9 = vpop.f32.mrf.mxu0 }
 0x27d   :  { %v892_v10 = vadd.f32 %v1420_v60, %v891_v9 }
 0x27f   :  { %v899_v12 = vmax.f32 %v892_v10, 0.0 }
 0x281   :  { %v902_v13 = vpack.c.bf16 %v899_v12, %v899_v12 }
 0x284   :  { %v893_v11 = vpop.f32.mrf.mxu0 }
 0x28b   :  { %989 = vmatmul.bf16.gmra.mxu1 %v902_v13 }
 0x2e8   :  { %v980_v15 = vpop.f32.mrf.mxu1 }
 0x2e9   :  { %v981_v16 = vadd.f32 %v1421_v14, %v980_v15 }
 0x2eb   :  { %994 = vst [vmem:[#allocation11] sm:$0xff] %v981_v16 }
 0x2f0   :  { %v982_v17 = vpop.f32.mrf.mxu1 }
 0x2f1   :  { %v983_v18 = vadd.f32 %v1421_v14, %v982_v17 }
 0x2f3   :  { %995 = vst [vmem:[#allocation11 + $0x8] sm:$0xff] %v983_v18 }
 0x2f8   :  { %v985_v19 = vpop.f32.mrf.mxu1 }
 0x2f9   :  { %v986_v20 = vadd.f32 %v1421_v14, %v985_v19 }
 0x2fb   :  { %996 = vst [vmem:[#allocation11 + $0x10] sm:$0xff] %v986_v20 }
 0x300   :  { %v987_v21 = vpop.f32.mrf.mxu1 }
 0x301   :  { %v988_v22 = vadd.f32 %v1421_v14, %v987_v21 }
 0x303   :  { %997 = vst [vmem:[#allocation11 + $0x18] sm:$0xff] %v988_v22 }
 0x308   :  { %v990_v23 = vpop.f32.mrf.mxu1 }
 0x309   :  { %v991_v24 = vadd.f32 %v1421_v14, %v990_v23 }
 0x30b   :  { %998 = vst [vmem:[#allocation11 + $0x20] sm:$0xff] %v991_v24 }
 0x30c   :  { %1011 = dma.vmem_to_hbm [thread:$0]  %s1004_s19, 640, %s1006_s4, [#allocation4], %s1575_s30, %s1575_s30, %s1576_s14  }
 0x310   :  { %v992_v25 = vpop.f32.mrf.mxu1 }
 0x311   :  { %1572 = dma.done.wait [#allocation4], 640  }
 0x312   :  { %1573 = vsyncadd [#allocation4], 4294966656 }
 0x313   :  { %1016 = vsyncpa [#allocation3], 1 }
 0x314   :  { %1017 = vsyncpa [#allocation6], 1 }
 0x315   :  { %1018 = vsyncpa [#allocation9], 1 }
 0x316   :  { %1019 = vsyncpa [#allocation4], 1 }

</bundles_post_ra>
